<compile_context>
chip_gen: v7x
topology: tpu7x:2x2x1
jax: 0.10.0
libtpu: 0.0.40
codegen_flags: <defaults>
</compile_context>

<pallas_src>
import functools

import jax
import jax.numpy as jnp
from jax import lax
from jax.experimental import pallas as pl
from jax.experimental.pallas import tpu as pltpu


# -----------------------------------------------------------------------------
# Pallas kernel: one batch element, all layers.
# -----------------------------------------------------------------------------
def _wn_kernel(x_ref, mask_ref, g_ref,
               in_w_ref, in_b_ref, cond_w_ref, cond_b_ref,
               rs_w_ref, rs_b_ref, out_ref,
               xpad_ref,
               *, hidden, kernel_size, dilation_rate, n_layers, pad_max):
    T = x_ref.shape[1]
    H = hidden
    K = kernel_size

    x = x_ref[0].astype(jnp.float32)                        # [T, H] residual (f32)
    # Hoist the mask broadcast out of the layer loop.
    mask_b = jnp.broadcast_to(mask_ref[0].astype(jnp.float32), (T, H))

    # Hoisted conditioning projection for ALL layers: one lane-dense matmul
    # (T, gin) @ (gin, 2H*L), bf16 inputs -> f32 accumulation on the MXU.
    g_all = jnp.dot(g_ref[0].astype(jnp.bfloat16), cond_w_ref[...],
                    preferred_element_type=jnp.float32) + cond_b_ref[...]

    # Zero ONLY the halo rows of the padded scratch (the centre is rewritten
    # every layer); the halo stays zero and implements the "same"-conv padding.
    if pad_max > 0:
        zeros_halo = jnp.zeros((pad_max, H), xpad_ref.dtype)
        xpad_ref[pl.ds(0, pad_max), :] = zeros_halo
        xpad_ref[pl.ds(pad_max + T, pad_max), :] = zeros_halo

    output = jnp.zeros((T, H), jnp.float32)

    # TODO(synk): for large n_layers switch to lax.fori_loop over the uniformly
    # packed weights, and tile T (with a conv halo) for long sequences.
    for i in range(n_layers):
        d = dilation_rate ** i
        pad = (K * d - d) // 2

        # Current residual stream into the centre of the padded scratch.
        xpad_ref[pl.ds(pad_max, T), :] = x

        # Dilated "same" conv as K shifted matmuls accumulated in f32.
        x_in = in_b_ref[i]                                   # [1, 2H] broadcast
        for k in range(K):
            off = pad_max - pad + k * d                      # static per layer
            tap = xpad_ref[pl.ds(off, T), :].astype(jnp.bfloat16)
            x_in = x_in + jnp.dot(tap, in_w_ref[i * K + k],
                                  preferred_element_type=jnp.float32)

        # TODO(synk): dropout with p_dropout=0 is the identity; nonzero dropout
        # would need pltpu.prng_* inside the kernel.

        # fused_add_tanh_sigmoid_multiply (tanh / sigmoid run on the EUP).
        in_act = x_in + g_all[:, i * 2 * H:(i + 1) * 2 * H]
        acts = jnp.tanh(in_act[:, :H]) * jax.nn.sigmoid(in_act[:, H:])

        # res/skip 1x1 conv, H -> 2H.  Last layer's res half is packed as zeros
        # so one uniform matmul covers every layer.
        res_skip = jnp.dot(acts.astype(jnp.bfloat16), rs_w_ref[i],
                           preferred_element_type=jnp.float32) + rs_b_ref[i]
        if i < n_layers - 1:
            x = (x + res_skip[:, :H]) * mask_b
        output = output + res_skip[:, H:]

    out_ref[0] = (output * mask_b).astype(out_ref.dtype)


# -----------------------------------------------------------------------------
# Wrapper: NCT (PyTorch) <-> NTC (kernel) transposes + pallas_call plumbing.
# -----------------------------------------------------------------------------
def wn_forward(x, x_mask, g, packed_params, *,
               hidden, kernel_size, dilation_rate, n_layers):
    # x: [B, H, T], x_mask: [B, 1, T], g: [B, gin, T]   (PyTorch NCT layout)
    B, H, T = x.shape
    gin = g.shape[1]
    K = kernel_size
    in_w, in_b, cond_w, cond_b, rs_w, rs_b = packed_params

    d_max = dilation_rate ** (n_layers - 1)
    pad_max = (K * d_max - d_max) // 2

    x_t = jnp.transpose(x, (0, 2, 1))
    mask_t = jnp.transpose(x_mask, (0, 2, 1))
    g_t = jnp.transpose(g, (0, 2, 1))

    kernel = functools.partial(
        _wn_kernel, hidden=H, kernel_size=K,
        dilation_rate=dilation_rate, n_layers=n_layers, pad_max=pad_max)

    def const_spec(a):
        # Weights: full array, constant block index across the batch grid, so
        # they are DMA'd once and reused by every grid step.
        nd = a.ndim
        return pl.BlockSpec(a.shape, lambda b, _nd=nd: (0,) * _nd)

    # VMEM budget sized to the actual footprint (bf16 weights + per-batch
    # activation blocks + f32 padded-residual scratch), with headroom;
    # clamped to 64 MiB (v7x physical per-TC VMEM).
    weight_bytes = sum(int(a.size) * a.dtype.itemsize for a in packed_params)
    act_bytes = 4 * (2 * T * H + T + T * gin)
    scratch_bytes = 4 * (T + 2 * pad_max) * H
    vmem_limit = int(min(64 * 1024 * 1024,
                         max(8 * 1024 * 1024,
                             4 * (weight_bytes + act_bytes + scratch_bytes))))

    out_t = pl.pallas_call(
        kernel,
        out_shape=jax.ShapeDtypeStruct((B, T, H), x.dtype),
        grid=(B,),
        in_specs=[
            pl.BlockSpec((1, T, H), lambda b: (b, 0, 0)),
            pl.BlockSpec((1, T, 1), lambda b: (b, 0, 0)),
            pl.BlockSpec((1, T, gin), lambda b: (b, 0, 0)),
            const_spec(in_w), const_spec(in_b),
            const_spec(cond_w), const_spec(cond_b),
            const_spec(rs_w), const_spec(rs_b),
        ],
        out_specs=pl.BlockSpec((1, T, H), lambda b: (b, 0, 0)),
        scratch_shapes=[
            pltpu.VMEM((T + 2 * pad_max, H), jnp.float32),   # padded residual
        ],
        compiler_params=pltpu.CompilerParams(
            dimension_semantics=("parallel",),
            vmem_limit_bytes=vmem_limit),
    )(x_t, mask_t, g_t, in_w, in_b, cond_w, cond_b, rs_w, rs_b)

    return jnp.transpose(out_t, (0, 2, 1))


# -----------------------------------------------------------------------------
# Parameter construction (deterministic, synthetic) + weight-norm realization.
# -----------------------------------------------------------------------------
def _weight_norm(v, g_scale):
    # v: [out, in, k]; per-output-channel L2 norm over (in, k), like torch's
    # weight_norm(name='weight') on Conv1d.
    norm = jnp.sqrt(jnp.sum(v * v, axis=(1, 2), keepdims=True))
    return g_scale[:, None, None] * v / norm


def init_wn_params(key, hidden, kernel_size, dilation_rate, n_layers, gin):
    H, K = hidden, kernel_size
    keys = iter(jax.random.split(key, 6 * n_layers + 8))

    def nrm(shape, scale):
        return jax.random.normal(next(keys), shape, jnp.float32) * scale

    # cond_layer: Conv1d(gin, 2H*n_layers, 1) with weight_norm
    cond_v = nrm((2 * H * n_layers, gin, 1), 1.0 / jnp.sqrt(gin))
    cond_g = 1.0 + 0.1 * jax.random.normal(next(keys), (2 * H * n_layers,), jnp.float32)
    cond_wt = _weight_norm(cond_v, cond_g)                       # [2H*L, gin, 1]
    cond_bt = nrm((2 * H * n_layers,), 0.1)

    in_wts, in_bts, rs_wts, rs_bts = [], [], [], []
    for i in range(n_layers):
        v = nrm((2 * H, H, K), 1.0 / jnp.sqrt(H * K))
        gsc = 1.0 + 0.1 * jax.random.normal(next(keys), (2 * H,), jnp.float32)
        in_wts.append(_weight_norm(v, gsc))                       # [2H, H, K]
        in_bts.append(nrm((2 * H,), 0.1))

        out_c = 2 * H if i < n_layers - 1 else H
        v = nrm((out_c, H, 1), 1.0 / jnp.sqrt(H))
        gsc = 1.0 + 0.1 * jax.random.normal(next(keys), (out_c,), jnp.float32)
        rs_wts.append(_weight_norm(v, gsc))                       # [out_c, H, 1]
        rs_bts.append(nrm((out_c,), 0.1))

    torch_params = (in_wts, in_bts, cond_wt, cond_bt, rs_wts, rs_bts)

    # ---- pack into kernel layout (weights bf16, biases f32) ----
    # in_w[(i*K + k), cin, cout] = in_wt[i][cout, cin, k]  -> per-tap matmuls
    in_w = jnp.concatenate(
        [jnp.transpose(w, (2, 1, 0)) for w in in_wts]).astype(jnp.bfloat16)   # [L*K,H,2H]
    in_b = jnp.stack([b[None, :] for b in in_bts])                            # [L,1,2H] f32
    # Conditioning for all layers in one matrix: [gin, 2H*L]
    cond_w = cond_wt[:, :, 0].T.astype(jnp.bfloat16)                          # [gin,2H*L]
    cond_b = cond_bt[None, :]                                                 # [1,2H*L] f32
    # rs_w[i] : [H, 2H]; last layer packed into the skip half [H:2H] (res half zeros)
    rs_w_list, rs_b_list = [], []
    for i in range(n_layers):
        if i < n_layers - 1:
            rs_w_list.append(rs_wts[i][:, :, 0].T)                            # [H,2H]
            rs_b_list.append(rs_bts[i][None, :])                              # [1,2H]
        else:
            w_last = rs_wts[i][:, :, 0].T                                     # [H,H]
            rs_w_list.append(jnp.concatenate(
                [jnp.zeros((H, H), jnp.float32), w_last], axis=1))            # [H,2H]
            rs_b_list.append(jnp.concatenate(
                [jnp.zeros((H,), jnp.float32), rs_bts[i]])[None, :])          # [1,2H]
    rs_w = jnp.stack(rs_w_list).astype(jnp.bfloat16)                          # [L,H,2H]
    rs_b = jnp.stack(rs_b_list)                                               # [L,1,2H] f32

    packed = (in_w, in_b, cond_w, cond_b, rs_w, rs_b)
    return packed, torch_params


# -----------------------------------------------------------------------------
# Pure-JAX reference mirroring the PyTorch module (NCT layout, lax convs, f32).
# -----------------------------------------------------------------------------
def wn_reference(x, x_mask, g, torch_params, *,
                 hidden, kernel_size, dilation_rate, n_layers):
    in_wts, in_bts, cond_wt, cond_bt, rs_wts, rs_bts = torch_params
    H = hidden
    dn = ("NCH", "OIH", "NCH")
    output = jnp.zeros_like(x)
    g_cond = lax.conv_general_dilated(
        g, cond_wt, (1,), "VALID", dimension_numbers=dn,
        precision=lax.Precision.HIGHEST) + cond_bt[None, :, None]
    for i in range(n_layers):
        d = dilation_rate ** i
        pad = (kernel_size * d - d) // 2
        x_in = lax.conv_general_dilated(
            x, in_wts[i], (1,), [(pad, pad)], rhs_dilation=(d,),
            dimension_numbers=dn, precision=lax.Precision.HIGHEST
        ) + in_bts[i][None, :, None]
        g_l = g_cond[:, i * 2 * H:(i + 1) * 2 * H, :]
        in_act = x_in + g_l
        acts = jnp.tanh(in_act[:, :H, :]) * jax.nn.sigmoid(in_act[:, H:, :])
        rs = lax.conv_general_dilated(
            acts, rs_wts[i], (1,), "VALID", dimension_numbers=dn,
            precision=lax.Precision.HIGHEST) + rs_bts[i][None, :, None]
        if i < n_layers - 1:
            x = (x + rs[:, :H, :]) * x_mask
            output = output + rs[:, H:, :]
        else:
            output = output + rs
    return output * x_mask


# -----------------------------------------------------------------------------
if __name__ == "__main__":
    B, H, T = 2, 16, 24          # batch, hidden_channels, sequence length
    K, DIL, L, GIN = 3, 2, 3, 8  # kernel_size, dilation_rate, n_layers, gin_channels

    key = jax.random.PRNGKey(0)
    k_x, k_g, k_p = jax.random.split(key, 3)

    x = jax.random.normal(k_x, (B, H, T), jnp.float32)
    g = jax.random.normal(k_g, (B, GIN, T), jnp.float32)
    # sequence-length style mask: first row full length, second row shorter
    lengths = jnp.array([T, T - 6])
    x_mask = (jnp.arange(T)[None, None, :] < lengths[:, None, None]).astype(jnp.float32)

    packed, torch_params = init_wn_params(k_p, H, K, DIL, L, GIN)

    out = wn_forward(x, x_mask, g, packed,
                     hidden=H, kernel_size=K, dilation_rate=DIL, n_layers=L)
    out = jax.block_until_ready(out)

    ref = wn_reference(x, x_mask, g, torch_params,
                       hidden=H, kernel_size=K, dilation_rate=DIL, n_layers=L)
    ref = jax.block_until_ready(ref)

    assert out.shape == (B, H, T) and out.dtype == jnp.float32
    # Tolerance accounts for bf16 matmul inputs (f32 accumulation) vs. the
    # HIGHEST-precision f32 reference.
    assert jnp.allclose(out, ref, atol=1e-1, rtol=5e-2), \
        f"max err {jnp.max(jnp.abs(out - ref))}"

    print("KERNEL_OK")
</pallas_src>

<mosaic_0001>
module attributes {stable_mosaic.version = 11 : i64} {
  func.func @_wn_kernel(%arg0: i32, %arg1: memref<1x24x16xf32, #tpu.memory_space<vmem>>, %arg2: memref<1x24x1xf32, #tpu.memory_space<vmem>>, %arg3: memref<1x24x8xf32, #tpu.memory_space<vmem>>, %arg4: memref<9x16x32xbf16, #tpu.memory_space<vmem>>, %arg5: memref<3x1x32xf32, #tpu.memory_space<vmem>>, %arg6: memref<8x96xbf16, #tpu.memory_space<vmem>>, %arg7: memref<1x96xf32, #tpu.memory_space<vmem>>, %arg8: memref<3x16x32xbf16, #tpu.memory_space<vmem>>, %arg9: memref<3x1x32xf32, #tpu.memory_space<vmem>>, %arg10: memref<1x24x16xf32, #tpu.memory_space<vmem>>, %arg11: memref<32x16xf32, #tpu.memory_space<vmem>>) attributes {dimension_semantics = [#tpu.dimension_semantics<parallel>], iteration_bounds = array<i64: 2>, scalar_prefetch = 0 : i64, scratch_operands = 1 : i64, tpu.core_type = #tpu.core_type<tc>, window_params = [{transform_indices = @transform_0, window_bounds = array<i64: 1, 24, 16>}, {transform_indices = @transform_1, window_bounds = array<i64: 1, 24, 1>}, {transform_indices = @transform_2, window_bounds = array<i64: 1, 24, 8>}, {pipeline_mode = #tpu.pipeline_mode<synchronous>, transform_indices = @transform_3, window_bounds = array<i64: 9, 16, 32>}, {pipeline_mode = #tpu.pipeline_mode<synchronous>, transform_indices = @transform_4, window_bounds = array<i64: 3, 1, 32>}, {pipeline_mode = #tpu.pipeline_mode<synchronous>, transform_indices = @transform_5, window_bounds = array<i64: 8, 96>}, {pipeline_mode = #tpu.pipeline_mode<synchronous>, transform_indices = @transform_6, window_bounds = array<i64: 1, 96>}, {pipeline_mode = #tpu.pipeline_mode<synchronous>, transform_indices = @transform_7, window_bounds = array<i64: 3, 16, 32>}, {pipeline_mode = #tpu.pipeline_mode<synchronous>, transform_indices = @transform_8, window_bounds = array<i64: 3, 1, 32>}, {transform_indices = @transform_9, window_bounds = array<i64: 1, 24, 16>}]} {
    %c0 = arith.constant 0 : index
    %c0_0 = arith.constant 0 : index
    %c0_1 = arith.constant 0 : index
    %0 = vector.load %arg1[%c0, %c0_0, %c0_1] : memref<1x24x16xf32, #tpu.memory_space<vmem>>, vector<1x24x16xf32>
    %1 = vector.shape_cast %0 : vector<1x24x16xf32> to vector<24x16xf32>
    %c0_2 = arith.constant 0 : index
    %c0_3 = arith.constant 0 : index
    %c0_4 = arith.constant 0 : index
    %2 = vector.load %arg2[%c0_2, %c0_3, %c0_4] : memref<1x24x1xf32, #tpu.memory_space<vmem>>, vector<1x24x1xf32>
    %3 = vector.shape_cast %2 : vector<1x24x1xf32> to vector<24x1xf32>
    %4 = vector.shape_cast %3 : vector<24x1xf32> to vector<24x1xf32>
    %5 = vector.broadcast %4 : vector<24x1xf32> to vector<24x16xf32>
    %c0_5 = arith.constant 0 : index
    %c0_6 = arith.constant 0 : index
    %c0_7 = arith.constant 0 : index
    %6 = vector.load %arg3[%c0_5, %c0_6, %c0_7] : memref<1x24x8xf32, #tpu.memory_space<vmem>>, vector<1x24x8xf32>
    %7 = vector.shape_cast %6 : vector<1x24x8xf32> to vector<24x8xf32>
    %8 = arith.truncf %7 : vector<24x8xf32> to vector<24x8xbf16>
    %c0_8 = arith.constant 0 : index
    %c0_9 = arith.constant 0 : index
    %9 = vector.load %arg6[%c0_8, %c0_9] : memref<8x96xbf16, #tpu.memory_space<vmem>>, vector<8x96xbf16>
    %cst = arith.constant dense<0.000000e+00> : vector<24x96xf32>
    %10 = tpu.matmul %8, %9, %cst {dimension_numbers = #tpu.dot_dimension_numbers<[1], [0], [0], [1], [0, 0, 1, 1], [], []>} : vector<24x8xbf16>, vector<8x96xbf16>, vector<24x96xf32> -> vector<24x96xf32>
    %c0_10 = arith.constant 0 : index
    %c0_11 = arith.constant 0 : index
    %11 = vector.load %arg7[%c0_10, %c0_11] : memref<1x96xf32, #tpu.memory_space<vmem>>, vector<1x96xf32>
    %12 = vector.broadcast %11 : vector<1x96xf32> to vector<24x96xf32>
    %13 = arith.addf %10, %12 : vector<24x96xf32>
    %cst_12 = arith.constant 0.000000e+00 : f32
    %14 = vector.broadcast %cst_12 : f32 to vector<4x16xf32>
    %c0_13 = arith.constant 0 : index
    %c0_14 = arith.constant 0 : index
    %15 = vector.load %arg11[%c0_13, %c0_14] : memref<32x16xf32, #tpu.memory_space<vmem>>, vector<4x16xf32>
    tpu.vector_store %arg11[%c0_13, %c0_14], %14 {strides = array<i32>} : memref<32x16xf32, #tpu.memory_space<vmem>>, vector<4x16xf32>,
    %c28 = arith.constant 28 : index
    %c0_15 = arith.constant 0 : index
    %16 = vector.load %arg11[%c28, %c0_15] : memref<32x16xf32, #tpu.memory_space<vmem>>, vector<4x16xf32>
    tpu.vector_store %arg11[%c28, %c0_15], %14 {strides = array<i32>} : memref<32x16xf32, #tpu.memory_space<vmem>>, vector<4x16xf32>,
    %cst_16 = arith.constant 0.000000e+00 : f32
    %17 = vector.broadcast %cst_16 : f32 to vector<24x16xf32>
    %c4 = arith.constant 4 : index
    %c0_17 = arith.constant 0 : index
    %18 = vector.load %arg11[%c4, %c0_17] : memref<32x16xf32, #tpu.memory_space<vmem>>, vector<24x16xf32>
    tpu.vector_store %arg11[%c4, %c0_17], %1 {strides = array<i32>} : memref<32x16xf32, #tpu.memory_space<vmem>>, vector<24x16xf32>,
    %c0_18 = arith.constant 0 : index
    %c0_19 = arith.constant 0 : index
    %c0_20 = arith.constant 0 : index
    %19 = vector.load %arg5[%c0_18, %c0_19, %c0_20] : memref<3x1x32xf32, #tpu.memory_space<vmem>>, vector<1x1x32xf32>
    %20 = vector.shape_cast %19 : vector<1x1x32xf32> to vector<1x32xf32>
    %c3 = arith.constant 3 : index
    %c0_21 = arith.constant 0 : index
    %21 = vector.load %arg11[%c3, %c0_21] : memref<32x16xf32, #tpu.memory_space<vmem>>, vector<24x16xf32>
    %22 = arith.truncf %21 : vector<24x16xf32> to vector<24x16xbf16>
    %c0_22 = arith.constant 0 : index
    %c0_23 = arith.constant 0 : index
    %c0_24 = arith.constant 0 : index
    %23 = vector.load %arg4[%c0_22, %c0_23, %c0_24] : memref<9x16x32xbf16, #tpu.memory_space<vmem>>, vector<1x16x32xbf16>
    %24 = vector.shape_cast %23 : vector<1x16x32xbf16> to vector<16x32xbf16>
    %cst_25 = arith.constant dense<0.000000e+00> : vector<24x32xf32>
    %25 = tpu.matmul %22, %24, %cst_25 {dimension_numbers = #tpu.dot_dimension_numbers<[1], [0], [0], [1], [0, 0, 1, 1], [], []>} : vector<24x16xbf16>, vector<16x32xbf16>, vector<24x32xf32> -> vector<24x32xf32>
    %26 = vector.broadcast %20 : vector<1x32xf32> to vector<24x32xf32>
    %27 = arith.addf %26, %25 : vector<24x32xf32>
    %c4_26 = arith.constant 4 : index
    %c0_27 = arith.constant 0 : index
    %28 = vector.load %arg11[%c4_26, %c0_27] : memref<32x16xf32, #tpu.memory_space<vmem>>, vector<24x16xf32>
    %29 = arith.truncf %28 : vector<24x16xf32> to vector<24x16xbf16>
    %c1 = arith.constant 1 : index
    %c0_28 = arith.constant 0 : index
    %c0_29 = arith.constant 0 : index
    %30 = vector.load %arg4[%c1, %c0_28, %c0_29] : memref<9x16x32xbf16, #tpu.memory_space<vmem>>, vector<1x16x32xbf16>
    %31 = vector.shape_cast %30 : vector<1x16x32xbf16> to vector<16x32xbf16>
    %cst_30 = arith.constant dense<0.000000e+00> : vector<24x32xf32>
    %32 = tpu.matmul %29, %31, %cst_30 {dimension_numbers = #tpu.dot_dimension_numbers<[1], [0], [0], [1], [0, 0, 1, 1], [], []>} : vector<24x16xbf16>, vector<16x32xbf16>, vector<24x32xf32> -> vector<24x32xf32>
    %33 = arith.addf %27, %32 : vector<24x32xf32>
    %c5 = arith.constant 5 : index
    %c0_31 = arith.constant 0 : index
    %34 = vector.load %arg11[%c5, %c0_31] : memref<32x16xf32, #tpu.memory_space<vmem>>, vector<24x16xf32>
    %35 = arith.truncf %34 : vector<24x16xf32> to vector<24x16xbf16>
    %c2 = arith.constant 2 : index
    %c0_32 = arith.constant 0 : index
    %c0_33 = arith.constant 0 : index
    %36 = vector.load %arg4[%c2, %c0_32, %c0_33] : memref<9x16x32xbf16, #tpu.memory_space<vmem>>, vector<1x16x32xbf16>
    %37 = vector.shape_cast %36 : vector<1x16x32xbf16> to vector<16x32xbf16>
    %cst_34 = arith.constant dense<0.000000e+00> : vector<24x32xf32>
    %38 = tpu.matmul %35, %37, %cst_34 {dimension_numbers = #tpu.dot_dimension_numbers<[1], [0], [0], [1], [0, 0, 1, 1], [], []>} : vector<24x16xbf16>, vector<16x32xbf16>, vector<24x32xf32> -> vector<24x32xf32>
    %39 = arith.addf %33, %38 : vector<24x32xf32>
    %40 = vector.extract_strided_slice %13 {offsets = [0, 0], sizes = [24, 32], strides = [1, 1]} : vector<24x96xf32> to vector<24x32xf32>
    %41 = arith.addf %39, %40 : vector<24x32xf32>
    %42 = vector.extract_strided_slice %41 {offsets = [0, 0], sizes = [24, 16], strides = [1, 1]} : vector<24x32xf32> to vector<24x16xf32>
    %43 = math.tanh %42 : vector<24x16xf32>
    %44 = vector.extract_strided_slice %41 {offsets = [0, 16], sizes = [24, 16], strides = [1, 1]} : vector<24x32xf32> to vector<24x16xf32>
    %45 = arith.negf %44 : vector<24x16xf32>
    %46 = math.exp %45 : vector<24x16xf32>
    %cst_35 = arith.constant 1.000000e+00 : f32
    %47 = vector.broadcast %cst_35 : f32 to vector<24x16xf32>
    %48 = arith.addf %47, %46 : vector<24x16xf32>
    %49 = arith.divf %47, %48 : vector<24x16xf32>
    %50 = arith.mulf %43, %49 : vector<24x16xf32>
    %51 = arith.truncf %50 : vector<24x16xf32> to vector<24x16xbf16>
    %c0_36 = arith.constant 0 : index
    %c0_37 = arith.constant 0 : index
    %c0_38 = arith.constant 0 : index
    %52 = vector.load %arg8[%c0_36, %c0_37, %c0_38] : memref<3x16x32xbf16, #tpu.memory_space<vmem>>, vector<1x16x32xbf16>
    %53 = vector.shape_cast %52 : vector<1x16x32xbf16> to vector<16x32xbf16>
    %cst_39 = arith.constant dense<0.000000e+00> : vector<24x32xf32>
    %54 = tpu.matmul %51, %53, %cst_39 {dimension_numbers = #tpu.dot_dimension_numbers<[1], [0], [0], [1], [0, 0, 1, 1], [], []>} : vector<24x16xbf16>, vector<16x32xbf16>, vector<24x32xf32> -> vector<24x32xf32>
    %c0_40 = arith.constant 0 : index
    %c0_41 = arith.constant 0 : index
    %c0_42 = arith.constant 0 : index
    %55 = vector.load %arg9[%c0_40, %c0_41, %c0_42] : memref<3x1x32xf32, #tpu.memory_space<vmem>>, vector<1x1x32xf32>
    %56 = vector.shape_cast %55 : vector<1x1x32xf32> to vector<1x32xf32>
    %57 = vector.broadcast %56 : vector<1x32xf32> to vector<24x32xf32>
    %58 = arith.addf %54, %57 : vector<24x32xf32>
    %59 = vector.extract_strided_slice %58 {offsets = [0, 0], sizes = [24, 16], strides = [1, 1]} : vector<24x32xf32> to vector<24x16xf32>
    %60 = arith.addf %1, %59 : vector<24x16xf32>
    %61 = arith.mulf %60, %5 : vector<24x16xf32>
    %62 = vector.extract_strided_slice %58 {offsets = [0, 16], sizes = [24, 16], strides = [1, 1]} : vector<24x32xf32> to vector<24x16xf32>
    %63 = arith.addf %17, %62 : vector<24x16xf32>
    %c4_43 = arith.constant 4 : index
    %c0_44 = arith.constant 0 : index
    %64 = vector.load %arg11[%c4_43, %c0_44] : memref<32x16xf32, #tpu.memory_space<vmem>>, vector<24x16xf32>
    tpu.vector_store %arg11[%c4_43, %c0_44], %61 {strides = array<i32>} : memref<32x16xf32, #tpu.memory_space<vmem>>, vector<24x16xf32>,
    %c1_45 = arith.constant 1 : index
    %c0_46 = arith.constant 0 : index
    %c0_47 = arith.constant 0 : index
    %65 = vector.load %arg5[%c1_45, %c0_46, %c0_47] : memref<3x1x32xf32, #tpu.memory_space<vmem>>, vector<1x1x32xf32>
    %66 = vector.shape_cast %65 : vector<1x1x32xf32> to vector<1x32xf32>
    %c2_48 = arith.constant 2 : index
    %c0_49 = arith.constant 0 : index
    %67 = vector.load %arg11[%c2_48, %c0_49] : memref<32x16xf32, #tpu.memory_space<vmem>>, vector<24x16xf32>
    %68 = arith.truncf %67 : vector<24x16xf32> to vector<24x16xbf16>
    %c3_50 = arith.constant 3 : index
    %c0_51 = arith.constant 0 : index
    %c0_52 = arith.constant 0 : index
    %69 = vector.load %arg4[%c3_50, %c0_51, %c0_52] : memref<9x16x32xbf16, #tpu.memory_space<vmem>>, vector<1x16x32xbf16>
    %70 = vector.shape_cast %69 : vector<1x16x32xbf16> to vector<16x32xbf16>
    %cst_53 = arith.constant dense<0.000000e+00> : vector<24x32xf32>
    %71 = tpu.matmul %68, %70, %cst_53 {dimension_numbers = #tpu.dot_dimension_numbers<[1], [0], [0], [1], [0, 0, 1, 1], [], []>} : vector<24x16xbf16>, vector<16x32xbf16>, vector<24x32xf32> -> vector<24x32xf32>
    %72 = vector.broadcast %66 : vector<1x32xf32> to vector<24x32xf32>
    %73 = arith.addf %72, %71 : vector<24x32xf32>
    %c4_54 = arith.constant 4 : index
    %c0_55 = arith.constant 0 : index
    %74 = vector.load %arg11[%c4_54, %c0_55] : memref<32x16xf32, #tpu.memory_space<vmem>>, vector<24x16xf32>
    %75 = arith.truncf %74 : vector<24x16xf32> to vector<24x16xbf16>
    %c4_56 = arith.constant 4 : index
    %c0_57 = arith.constant 0 : index
    %c0_58 = arith.constant 0 : index
    %76 = vector.load %arg4[%c4_56, %c0_57, %c0_58] : memref<9x16x32xbf16, #tpu.memory_space<vmem>>, vector<1x16x32xbf16>
    %77 = vector.shape_cast %76 : vector<1x16x32xbf16> to vector<16x32xbf16>
    %cst_59 = arith.constant dense<0.000000e+00> : vector<24x32xf32>
    %78 = tpu.matmul %75, %77, %cst_59 {dimension_numbers = #tpu.dot_dimension_numbers<[1], [0], [0], [1], [0, 0, 1, 1], [], []>} : vector<24x16xbf16>, vector<16x32xbf16>, vector<24x32xf32> -> vector<24x32xf32>
    %79 = arith.addf %73, %78 : vector<24x32xf32>
    %c6 = arith.constant 6 : index
    %c0_60 = arith.constant 0 : index
    %80 = vector.load %arg11[%c6, %c0_60] : memref<32x16xf32, #tpu.memory_space<vmem>>, vector<24x16xf32>
    %81 = arith.truncf %80 : vector<24x16xf32> to vector<24x16xbf16>
    %c5_61 = arith.constant 5 : index
    %c0_62 = arith.constant 0 : index
    %c0_63 = arith.constant 0 : index
    %82 = vector.load %arg4[%c5_61, %c0_62, %c0_63] : memref<9x16x32xbf16, #tpu.memory_space<vmem>>, vector<1x16x32xbf16>
    %83 = vector.shape_cast %82 : vector<1x16x32xbf16> to vector<16x32xbf16>
    %cst_64 = arith.constant dense<0.000000e+00> : vector<24x32xf32>
    %84 = tpu.matmul %81, %83, %cst_64 {dimension_numbers = #tpu.dot_dimension_numbers<[1], [0], [0], [1], [0, 0, 1, 1], [], []>} : vector<24x16xbf16>, vector<16x32xbf16>, vector<24x32xf32> -> vector<24x32xf32>
    %85 = arith.addf %79, %84 : vector<24x32xf32>
    %86 = vector.extract_strided_slice %13 {offsets = [0, 32], sizes = [24, 32], strides = [1, 1]} : vector<24x96xf32> to vector<24x32xf32>
    %87 = arith.addf %85, %86 : vector<24x32xf32>
    %88 = vector.extract_strided_slice %87 {offsets = [0, 0], sizes = [24, 16], strides = [1, 1]} : vector<24x32xf32> to vector<24x16xf32>
    %89 = math.tanh %88 : vector<24x16xf32>
    %90 = vector.extract_strided_slice %87 {offsets = [0, 16], sizes = [24, 16], strides = [1, 1]} : vector<24x32xf32> to vector<24x16xf32>
    %91 = arith.negf %90 : vector<24x16xf32>
    %92 = math.exp %91 : vector<24x16xf32>
    %cst_65 = arith.constant 1.000000e+00 : f32
    %93 = vector.broadcast %cst_65 : f32 to vector<24x16xf32>
    %94 = arith.addf %93, %92 : vector<24x16xf32>
    %95 = arith.divf %93, %94 : vector<24x16xf32>
    %96 = arith.mulf %89, %95 : vector<24x16xf32>
    %97 = arith.truncf %96 : vector<24x16xf32> to vector<24x16xbf16>
    %c1_66 = arith.constant 1 : index
    %c0_67 = arith.constant 0 : index
    %c0_68 = arith.constant 0 : index
    %98 = vector.load %arg8[%c1_66, %c0_67, %c0_68] : memref<3x16x32xbf16, #tpu.memory_space<vmem>>, vector<1x16x32xbf16>
    %99 = vector.shape_cast %98 : vector<1x16x32xbf16> to vector<16x32xbf16>
    %cst_69 = arith.constant dense<0.000000e+00> : vector<24x32xf32>
    %100 = tpu.matmul %97, %99, %cst_69 {dimension_numbers = #tpu.dot_dimension_numbers<[1], [0], [0], [1], [0, 0, 1, 1], [], []>} : vector<24x16xbf16>, vector<16x32xbf16>, vector<24x32xf32> -> vector<24x32xf32>
    %c1_70 = arith.constant 1 : index
    %c0_71 = arith.constant 0 : index
    %c0_72 = arith.constant 0 : index
    %101 = vector.load %arg9[%c1_70, %c0_71, %c0_72] : memref<3x1x32xf32, #tpu.memory_space<vmem>>, vector<1x1x32xf32>
    %102 = vector.shape_cast %101 : vector<1x1x32xf32> to vector<1x32xf32>
    %103 = vector.broadcast %102 : vector<1x32xf32> to vector<24x32xf32>
    %104 = arith.addf %100, %103 : vector<24x32xf32>
    %105 = vector.extract_strided_slice %104 {offsets = [0, 0], sizes = [24, 16], strides = [1, 1]} : vector<24x32xf32> to vector<24x16xf32>
    %106 = arith.addf %61, %105 : vector<24x16xf32>
    %107 = arith.mulf %106, %5 : vector<24x16xf32>
    %108 = vector.extract_strided_slice %104 {offsets = [0, 16], sizes = [24, 16], strides = [1, 1]} : vector<24x32xf32> to vector<24x16xf32>
    %109 = arith.addf %63, %108 : vector<24x16xf32>
    %c4_73 = arith.constant 4 : index
    %c0_74 = arith.constant 0 : index
    %110 = vector.load %arg11[%c4_73, %c0_74] : memref<32x16xf32, #tpu.memory_space<vmem>>, vector<24x16xf32>
    tpu.vector_store %arg11[%c4_73, %c0_74], %107 {strides = array<i32>} : memref<32x16xf32, #tpu.memory_space<vmem>>, vector<24x16xf32>,
    %c2_75 = arith.constant 2 : index
    %c0_76 = arith.constant 0 : index
    %c0_77 = arith.constant 0 : index
    %111 = vector.load %arg5[%c2_75, %c0_76, %c0_77] : memref<3x1x32xf32, #tpu.memory_space<vmem>>, vector<1x1x32xf32>
    %112 = vector.shape_cast %111 : vector<1x1x32xf32> to vector<1x32xf32>
    %c0_78 = arith.constant 0 : index
    %c0_79 = arith.constant 0 : index
    %113 = vector.load %arg11[%c0_78, %c0_79] : memref<32x16xf32, #tpu.memory_space<vmem>>, vector<24x16xf32>
    %114 = arith.truncf %113 : vector<24x16xf32> to vector<24x16xbf16>
    %c6_80 = arith.constant 6 : index
    %c0_81 = arith.constant 0 : index
    %c0_82 = arith.constant 0 : index
    %115 = vector.load %arg4[%c6_80, %c0_81, %c0_82] : memref<9x16x32xbf16, #tpu.memory_space<vmem>>, vector<1x16x32xbf16>
    %116 = vector.shape_cast %115 : vector<1x16x32xbf16> to vector<16x32xbf16>
    %cst_83 = arith.constant dense<0.000000e+00> : vector<24x32xf32>
    %117 = tpu.matmul %114, %116, %cst_83 {dimension_numbers = #tpu.dot_dimension_numbers<[1], [0], [0], [1], [0, 0, 1, 1], [], []>} : vector<24x16xbf16>, vector<16x32xbf16>, vector<24x32xf32> -> vector<24x32xf32>
    %118 = vector.broadcast %112 : vector<1x32xf32> to vector<24x32xf32>
    %119 = arith.addf %118, %117 : vector<24x32xf32>
    %c4_84 = arith.constant 4 : index
    %c0_85 = arith.constant 0 : index
    %120 = vector.load %arg11[%c4_84, %c0_85] : memref<32x16xf32, #tpu.memory_space<vmem>>, vector<24x16xf32>
    %121 = arith.truncf %120 : vector<24x16xf32> to vector<24x16xbf16>
    %c7 = arith.constant 7 : index
    %c0_86 = arith.constant 0 : index
    %c0_87 = arith.constant 0 : index
    %122 = vector.load %arg4[%c7, %c0_86, %c0_87] : memref<9x16x32xbf16, #tpu.memory_space<vmem>>, vector<1x16x32xbf16>
    %123 = vector.shape_cast %122 : vector<1x16x32xbf16> to vector<16x32xbf16>
    %cst_88 = arith.constant dense<0.000000e+00> : vector<24x32xf32>
    %124 = tpu.matmul %121, %123, %cst_88 {dimension_numbers = #tpu.dot_dimension_numbers<[1], [0], [0], [1], [0, 0, 1, 1], [], []>} : vector<24x16xbf16>, vector<16x32xbf16>, vector<24x32xf32> -> vector<24x32xf32>
    %125 = arith.addf %119, %124 : vector<24x32xf32>
    %c8 = arith.constant 8 : index
    %c0_89 = arith.constant 0 : index
    %126 = vector.load %arg11[%c8, %c0_89] : memref<32x16xf32, #tpu.memory_space<vmem>>, vector<24x16xf32>
    %127 = arith.truncf %126 : vector<24x16xf32> to vector<24x16xbf16>
    %c8_90 = arith.constant 8 : index
    %c0_91 = arith.constant 0 : index
    %c0_92 = arith.constant 0 : index
    %128 = vector.load %arg4[%c8_90, %c0_91, %c0_92] : memref<9x16x32xbf16, #tpu.memory_space<vmem>>, vector<1x16x32xbf16>
    %129 = vector.shape_cast %128 : vector<1x16x32xbf16> to vector<16x32xbf16>
    %cst_93 = arith.constant dense<0.000000e+00> : vector<24x32xf32>
    %130 = tpu.matmul %127, %129, %cst_93 {dimension_numbers = #tpu.dot_dimension_numbers<[1], [0], [0], [1], [0, 0, 1, 1], [], []>} : vector<24x16xbf16>, vector<16x32xbf16>, vector<24x32xf32> -> vector<24x32xf32>
    %131 = arith.addf %125, %130 : vector<24x32xf32>
    %132 = vector.extract_strided_slice %13 {offsets = [0, 64], sizes = [24, 32], strides = [1, 1]} : vector<24x96xf32> to vector<24x32xf32>
    %133 = arith.addf %131, %132 : vector<24x32xf32>
    %134 = vector.extract_strided_slice %133 {offsets = [0, 0], sizes = [24, 16], strides = [1, 1]} : vector<24x32xf32> to vector<24x16xf32>
    %135 = math.tanh %134 : vector<24x16xf32>
    %136 = vector.extract_strided_slice %133 {offsets = [0, 16], sizes = [24, 16], strides = [1, 1]} : vector<24x32xf32> to vector<24x16xf32>
    %137 = arith.negf %136 : vector<24x16xf32>
    %138 = math.exp %137 : vector<24x16xf32>
    %cst_94 = arith.constant 1.000000e+00 : f32
    %139 = vector.broadcast %cst_94 : f32 to vector<24x16xf32>
    %140 = arith.addf %139, %138 : vector<24x16xf32>
    %141 = arith.divf %139, %140 : vector<24x16xf32>
    %142 = arith.mulf %135, %141 : vector<24x16xf32>
    %143 = arith.truncf %142 : vector<24x16xf32> to vector<24x16xbf16>
    %c2_95 = arith.constant 2 : index
    %c0_96 = arith.constant 0 : index
    %c0_97 = arith.constant 0 : index
    %144 = vector.load %arg8[%c2_95, %c0_96, %c0_97] : memref<3x16x32xbf16, #tpu.memory_space<vmem>>, vector<1x16x32xbf16>
    %145 = vector.shape_cast %144 : vector<1x16x32xbf16> to vector<16x32xbf16>
    %cst_98 = arith.constant dense<0.000000e+00> : vector<24x32xf32>
    %146 = tpu.matmul %143, %145, %cst_98 {dimension_numbers = #tpu.dot_dimension_numbers<[1], [0], [0], [1], [0, 0, 1, 1], [], []>} : vector<24x16xbf16>, vector<16x32xbf16>, vector<24x32xf32> -> vector<24x32xf32>
    %c2_99 = arith.constant 2 : index
    %c0_100 = arith.constant 0 : index
    %c0_101 = arith.constant 0 : index
    %147 = vector.load %arg9[%c2_99, %c0_100, %c0_101] : memref<3x1x32xf32, #tpu.memory_space<vmem>>, vector<1x1x32xf32>
    %148 = vector.shape_cast %147 : vector<1x1x32xf32> to vector<1x32xf32>
    %149 = vector.broadcast %148 : vector<1x32xf32> to vector<24x32xf32>
    %150 = arith.addf %146, %149 : vector<24x32xf32>
    %151 = vector.extract_strided_slice %150 {offsets = [0, 16], sizes = [24, 16], strides = [1, 1]} : vector<24x32xf32> to vector<24x16xf32>
    %152 = arith.addf %109, %151 : vector<24x16xf32>
    %153 = arith.mulf %152, %5 : vector<24x16xf32>
    %c0_102 = arith.constant 0 : index
    %c0_103 = arith.constant 0 : index
    %c0_104 = arith.constant 0 : index
    %154 = vector.load %arg10[%c0_102, %c0_103, %c0_104] : memref<1x24x16xf32, #tpu.memory_space<vmem>>, vector<1x24x16xf32>
    %155 = vector.shape_cast %154 : vector<1x24x16xf32> to vector<24x16xf32>
    %156 = vector.shape_cast %153 : vector<24x16xf32> to vector<1x24x16xf32>
    tpu.vector_store %arg10[%c0_102, %c0_103, %c0_104], %156 {strides = array<i32>} : memref<1x24x16xf32, #tpu.memory_space<vmem>>, vector<1x24x16xf32>,
    return
  }
  func.func @transform_0(%arg0: i32) -> (i32, i32, i32) {
    %c0_i32 = arith.constant 0 : i32
    %c0_i32_0 = arith.constant 0 : i32
    %c0_i32_1 = arith.constant 0 : i32
    return %arg0, %c0_i32, %c0_i32_0 : i32, i32, i32
  }
  func.func @transform_1(%arg0: i32) -> (i32, i32, i32) {
    %c0_i32 = arith.constant 0 : i32
    %c0_i32_0 = arith.constant 0 : i32
    %c0_i32_1 = arith.constant 0 : i32
    return %arg0, %c0_i32, %c0_i32_0 : i32, i32, i32
  }
  func.func @transform_2(%arg0: i32) -> (i32, i32, i32) {
    %c0_i32 = arith.constant 0 : i32
    %c0_i32_0 = arith.constant 0 : i32
    %c0_i32_1 = arith.constant 0 : i32
    return %arg0, %c0_i32, %c0_i32_0 : i32, i32, i32
  }
  func.func @transform_3(%arg0: i32) -> (i32, i32, i32) {
    %c0_i32 = arith.constant 0 : i32
    %c0_i32_0 = arith.constant 0 : i32
    %c0_i32_1 = arith.constant 0 : i32
    %c0_i32_2 = arith.constant 0 : i32
    return %c0_i32, %c0_i32_0, %c0_i32_1 : i32, i32, i32
  }
  func.func @transform_4(%arg0: i32) -> (i32, i32, i32) {
    %c0_i32 = arith.constant 0 : i32
    %c0_i32_0 = arith.constant 0 : i32
    %c0_i32_1 = arith.constant 0 : i32
    %c0_i32_2 = arith.constant 0 : i32
    return %c0_i32, %c0_i32_0, %c0_i32_1 : i32, i32, i32
  }
  func.func @transform_5(%arg0: i32) -> (i32, i32) {
    %c0_i32 = arith.constant 0 : i32
    %c0_i32_0 = arith.constant 0 : i32
    %c0_i32_1 = arith.constant 0 : i32
    return %c0_i32, %c0_i32_0 : i32, i32
  }
  func.func @transform_6(%arg0: i32) -> (i32, i32) {
    %c0_i32 = arith.constant 0 : i32
    %c0_i32_0 = arith.constant 0 : i32
    %c0_i32_1 = arith.constant 0 : i32
    return %c0_i32, %c0_i32_0 : i32, i32
  }
  func.func @transform_7(%arg0: i32) -> (i32, i32, i32) {
    %c0_i32 = arith.constant 0 : i32
    %c0_i32_0 = arith.constant 0 : i32
    %c0_i32_1 = arith.constant 0 : i32
    %c0_i32_2 = arith.constant 0 : i32
    return %c0_i32, %c0_i32_0, %c0_i32_1 : i32, i32, i32
  }
  func.func @transform_8(%arg0: i32) -> (i32, i32, i32) {
    %c0_i32 = arith.constant 0 : i32
    %c0_i32_0 = arith.constant 0 : i32
    %c0_i32_1 = arith.constant 0 : i32
    %c0_i32_2 = arith.constant 0 : i32
    return %c0_i32, %c0_i32_0, %c0_i32_1 : i32, i32, i32
  }
  func.func @transform_9(%arg0: i32) -> (i32, i32, i32) {
    %c0_i32 = arith.constant 0 : i32
    %c0_i32_0 = arith.constant 0 : i32
    %c0_i32_1 = arith.constant 0 : i32
    return %arg0, %c0_i32, %c0_i32_0 : i32, i32, i32
  }
}

</mosaic_0001>

<bundles_post_ra>
// kernel: tpu_custom_call.1
= control target key start
LH: loop header
LB: loop body
LE: loop exit
PB: predicated region body
PF: predicated region fallthrough
CT: control target
= control target key end

     0   :  { %s1966_s30 = smov 0   ;;  %s2181_s0 = inlined_call_operand.vmem [shape: f32[2,24,16], index: 0, kind: input, shape index: {}]   ;;  %s2182_s1 = inlined_call_operand.vmem [shape: f32[2,24,1], index: 1, kind: input, shape index: {}]   ;;  %s2183_s2 = inlined_call_operand.vmem [shape: f32[2,24,8], index: 2, kind: input, shape index: {}]   ;;  %s2184_s3 = inlined_call_operand.vmem [shape: bf16[9,16,32], index: 3, kind: input, shape index: {}]   ;;  %s2185_s4 = inlined_call_operand.vmem [shape: f32[3,1,32], index: 4, kind: input, shape index: {}]   ;;  %s2186_s5 = inlined_call_operand.vmem [shape: bf16[8,96], index: 5, kind: input, shape index: {}]   ;;  %s2187_s6 = inlined_call_operand.vmem [shape: f32[1,96], index: 6, kind: input, shape index: {}]   ;;  %s2188_s7 = inlined_call_operand.vmem [shape: bf16[3,16,32], index: 7, kind: input, shape index: {}]   ;;  %s2189_s8 = inlined_call_operand.vmem [shape: f32[3,1,32], index: 8, kind: input, shape index: {}]   ;;  %s2190_s9 = inlined_call_operand.vmem [shape: f32[2,24,16], index: 9, kind: output, shape index: {}]  }
   0x1 LB: > { %s1614_s10 = sadd.s32 4294967295, %s1909_s30   ;;  %p1618_p0 = scmp.ge.s32.totalorder %s1909_s30, 1  ;;  %s1909_s30 = sphi %s1966_s30, %s19_s30  }
   0x2   : > { %p307_p1 = scmp.lt.s32.totalorder %s1909_s30, 3 }
   0x4   : > { %p308_p2 = pnand %p1618_p0, %p307_p1 }
   0x5   : > { %v400_v0 = vld [vmem:[%s2186_s5] sm:$0xf] (!%p308_p2)  ;;  %vm415_vm0 = vcmask (!%p308_p2), 1043456   ;;  %p353_p3 = scmp.lt.s32.totalorder (!%p308_p2), %s1614_s10, 1  ;;  %vm470_vm1 = vcmask (!%p308_p2), 130048   ;;  %v1838_v3 = vld [vmem:[%s2184_s3 + $0x8] sm:$0xff] (!%p308_p2)  }
   0x6   : > { %311 = sbr.rel (%p308_p2) target bundleno = 1956 (0x7a4), region = 56  ;;  %1820 = vmatprep.subr.msk.bf16.mxu0 (!%p308_p2), %vm415_vm0, %v400_v0  ;;  %v417_v1 = vsel (!%p308_p2), %vm415_vm0, %v400_v0, 0  ;;  %v1837_v2 = vld [vmem:[%s2184_s3] sm:$0xff] (!%p308_p2)   ;;  %vm467_vm2 = vcmask (!%p308_p2), 125952   ;;  %v1911_v4 = vmov (!%p308_p2), 0.0   ;;  %v1839_v5 = vld [vmem:[%s2184_s3 + $0x10] sm:$0xff] (!%p308_p2)  }
   0x7   : > { %1743 = vmatpush3.bf16.msra.mxu0 (!%p308_p2), %v417_v1  ;;  %1748 = vmatprep.subr.bf16.mxu1 (!%p308_p2), %v1837_v2  ;;  %468 = vst.msk [vmem:[#allocation2] sm:$0xf] (!%p308_p2), %vm467_vm2, %v1911_v4  ;;  %469 = vst.msk [vmem:[#allocation2 + $0x1c] sm:$0xf] (!%p308_p2), %vm467_vm2, %v1911_v4  ;;  %vm408_vm3 = vcmask (!%p308_p2), 64512   ;;  %v1912_v29 = vmov (!%p308_p2), 0  }
   0x8   : > { %1749 = vmatpush3.bf16.msra.mxu1 (!%p308_p2), %v1837_v2  ;;  %1754 = vmatprep.subr.bf16.mxu0 (!%p308_p2), %v1838_v3  ;;  %v1629_v34 = vld [vmem:[%s2185_s4] ss:$0 sm:$0xff] (!%p308_p2)  ;;  %s1913_s15 = smov (!%p308_p2), 112   ;;  %s1914_s16 = smov (!%p308_p2), 96  }
   0x9   : > { %1760 = vmatprep.subr.bf16.mxu1 (!%p308_p2), %v1839_v5  ;;  %1835 = vset.pattern.permute.xlu1 (!%p308_p2), %v1912_v29  ;;  %v1623_v48 = vld [vmem:[%s2187_s6] ss:$0 sm:$0xff] (!%p308_p2) }
   0xa   : > { %1836 = vset.pattern.permute.xlu0 (!%p308_p2), %v1912_v29  ;;  %v1841_v29 = vld [vmem:[%s2184_s3 + $0x18] sm:$0xff] (!%p308_p2)  }
   0xd   : > { %s2192_s10 = smov (!%p353_p3, %s1614_s10), 1 }
   0xe   : > { %s1983_s17 = smul.u32 24, %s2192_s10  ;;  %s1915_s10 = smov 64  }
  0x10   : > { %s357_s22 = scalar_lea.vmem %s2181_s0, %s1983_s17  ;;  %s367_s25 = scalar_lea.vmem %s2183_s2, %s1983_s17 }
  0x11   : > { %v1996_v6 = vld [vmem:[%s357_s22] sm:$0xff]  ;;  %v1998_v7 = vld [vmem:[%s357_s22 + $0x8] sm:$0xff]  ;;  %v2000_v8 = vld [vmem:[%s357_s22 + $0x10] sm:$0xff]  ;;  %s362_s14 = scalar_lea.vmem %s2182_s1, %s1983_s17  ;;  %s372_s29 = scalar_lea.vmem %s2190_s9, %s1983_s17 }
  0x12   : > { %v395_v9 = vld [vmem:[%s367_s25] sm:$0xff]  ;;  %v396_v10 = vld [vmem:[%s367_s25 + $0x8] sm:$0xff]  ;;  %v397_v11 = vld [vmem:[%s367_s25 + $0x10] sm:$0xff]  ;;  %471 = vst.msk [vmem:[#allocation2 + $0x4] sm:$0xff] %vm470_vm1, %v1996_v6 }
  0x13   : > { %472 = vst.msk [vmem:[#allocation2 + $0xc] sm:$0xff] %vm470_vm1, %v1998_v7  ;;  %473 = vst.msk [vmem:[#allocation2 + $0x14] sm:$0xff] %vm470_vm1, %v2000_v8  ;;  %v398_v12 = vpack.c.bf16 %v396_v10, %v395_v9  ;;  %v399_v13 = vpack.c.bf16 %v397_v11, %v397_v11  ;;  %v1840_v10 = vld [vmem:[%s2188_s7] sm:$0xff]  }
  0x15   : > { %1744 = vmatprep.mubr.msk.bf16.mxu0 %vm408_vm3, %v398_v12 }
  0x16   : > { %1745 = vmatmul.mubr.msk.bf16.vlgmr.msra.gmra.mrb[0].mxu0 %vm408_vm3, %v399_v13 }
  0x17   : > { %1755 = vmatpush3.bf16.msra.mxu0 %v1838_v3 }
  0x18   : > { %1766 = vmatprep.subr.bf16.mxu0 %v1840_v10 }
  0x19   : > { %v475_v14 = vld [vmem:[#allocation2 + $0x3] sm:$0xff] }
  0x1a   : > { %v476_v15 = vld [vmem:[#allocation2 + $0xb] sm:$0xff]  ;;  %v477_v16 = vld [vmem:[#allocation2 + $0x13] sm:$0xff] }
  0x1b   : > { %v478_v17 = vpack.c.bf16 %v476_v15, %v475_v14  ;;  %v479_v18 = vpack.c.bf16 %v477_v16, %v477_v16  ;;  %v551_v19 = vld [vmem:[#allocation2 + $0x4] sm:$0xff]  ;;  %v552_v20 = vld [vmem:[#allocation2 + $0xc] sm:$0xff]  ;;  %v553_v21 = vld [vmem:[#allocation2 + $0x14] sm:$0xff] }
  0x1c   : > { %v554_v22 = vpack.c.bf16 %v552_v20, %v551_v19  ;;  %v555_v23 = vpack.c.bf16 %v553_v21, %v553_v21  ;;  %v622_v24 = vld [vmem:[#allocation2 + $0x5] sm:$0xff]  ;;  %v623_v25 = vld [vmem:[#allocation2 + $0xd] sm:$0xff]  ;;  %v624_v27 = vld [vmem:[#allocation2 + $0x15] sm:$0xff] }
  0x1d   : > { %1750 = vmatprep.mubr.msk.bf16.mxu1 %vm470_vm1, %v478_v17  ;;  %v625_v26 = vpack.c.bf16 %v623_v25, %v622_v24  ;;  %v626_v28 = vpack.c.bf16 %v624_v27, %v624_v27  ;;  %v377_v14 = vld [vmem:[%s362_s14] sm:$0xff]  ;;  %v379_v16 = vld [vmem:[%s362_s14 + $0x10] sm:$0xff]  ;;  %v378_v17 = vld [vmem:[%s362_s14 + $0x8] sm:$0xff] }
  0x1e   : > { %1751 = vmatmul.mubr.msk.bf16.vlgmr.msra.gmra.mrb[0].mxu1 %vm470_vm1, %v479_v18  ;;  %1756 = vmatprep.mubr.msk.bf16.mxu0 %vm470_vm1, %v554_v22 }
  0x1f   : > { %1761 = vmatpush3.bf16.msra.mxu1 %v1839_v5  ;;  %1757 = vmatmul.mubr.msk.bf16.vlgmr.msra.gmra.mrb[4].mxu0 %vm470_vm1, %v555_v23 }
  0x20   : > { %1762 = vmatprep.mubr.msk.bf16.mxu1 %vm470_vm1, %v625_v26  ;;  %1767 = vmatpush3.bf16.msra.mxu0 %v1840_v10 }
  0x21   : > { %1772 = vmatprep.subr.bf16.mxu1 %v1841_v29 }
  0x26   : > { %1763 = vmatmul.mubr.msk.bf16.vlgmr.msra.gmra.mrb[4].mxu1 %vm470_vm1, %v626_v28 }
  0x27   : > { %1773 = vmatpush3.bf16.msra.mxu1 %v1841_v29 }
  0xe9   : > { %v1746_v30 = vpop.f32.mrb[0].mxu0 }
  0xea   : > { %v453_v31 = vpop.f32.mrb[1].mxu0  ;;  %v2020_v51 = vadd.f32 %v1746_v30, %v1623_v48  ;;  %v1842_v30 = vld [vmem:[%s2184_s3 + $0x20] sm:$0xff]  }
  0xeb   : > { %v1747_v32 = vpop.f32.mrb[2].mxu0  ;;  %v2022_v54 = vadd.f32 %v1623_v48, %v453_v31  ;;  %1778 = vmatprep.subr.bf16.mxu0 %v1842_v30  ;;  %v1843_v31 = vld [vmem:[%s2184_s3 + $0x28] sm:$0xff]  }
  0xec   : > { %v456_v33 = vpop.f32.mrb[3].mxu0  ;;  %1784 = vmatprep.subr.bf16.mxu1 %v1843_v31 }
  0xed   : > { %v2025_v59 = vadd.f32 %v1623_v48, %v456_v33  ;;  %v1643_v33 = vld [vmem:[%s2189_s8] ss:$0 sm:$0xff] }
  0xf1   : > { %v1752_v35 = vpop.f32.mrb[0].mxu1 }
  0xf2   : > { %v550_v36 = vadd.f32 %v1752_v35, %v1629_v34  ;;  %v528_v37 = vpop.f32.mrb[1].mxu1  ;;  %v1758_v38 = vpop.f32.mrb[4].mxu0 }
  0xf3   : > { %v548_v39 = vadd.f32 %v1629_v34, %v528_v37  ;;  %v1753_v40 = vpop.f32.mrb[2].mxu1  ;;  %v605_v41 = vpop.f32.mrb[5].mxu0 }
  0xf4   : > { %v621_v42 = vadd.f32 %v1758_v38, %v550_v36  ;;  %v531_v43 = vpop.f32.mrb[3].mxu1  ;;  %v1759_v44 = vpop.f32.mrb[6].mxu0 }
  0xf5   : > { %v549_v45 = vadd.f32 %v1629_v34, %v531_v43  ;;  %v619_v46 = vadd.f32 %v605_v41, %v548_v39  ;;  %v608_v47 = vpop.f32.mrb[7].mxu0 }
  0xf7   : > { %v620_v49 = vadd.f32 %v608_v47, %v549_v45 }
  0xf9   : > { %v1764_v50 = vpop.f32.mrb[4].mxu1 }
  0xfa   : > { %v692_v52 = vadd.f32 %v1764_v50, %v621_v42  ;;  %v676_v53 = vpop.f32.mrb[5].mxu1 }
  0xfb   : > { %v690_v55 = vadd.f32 %v676_v53, %v619_v46  ;;  %v1765_v56 = vpop.f32.mrb[6].mxu1 }
  0xfc   : > { %v695_v57 = vadd.f32 %v692_v52, %v2020_v51  ;;  %v679_v58 = vpop.f32.mrb[7].mxu1 }
  0xfd   : > { %v693_v60 = vadd.f32 %v690_v55, %v2022_v54  ;;  %v691_v61 = vadd.f32 %v679_v58, %v620_v49 }
  0xfe   : > { %v1642_v62 = vmul.f32 -1.442695, %v695_v57 }
  0xff   : > { %v1640_v63 = vmul.f32 -1.442695, %v693_v60  ;;  %v694_v0 = vadd.f32 %v691_v61, %v2025_v59 }
 0x100   : > { %1849 = vpow2.f32 %v1642_v62 }
 0x101   : > { %1851 = vpow2.f32 %v1640_v63  ;;  %v1641_v1 = vmul.f32 -1.442695, %v694_v0 }
 0x103   : > { %1853 = vpow2.f32 %v1641_v1  ;;  %v1653_v1 = vld [vmem:[%s2185_s4 + $0x1] ss:$0 sm:$0xff] }
 0x10a   : > { %v1850_v2 = vpop.eup %1849 }
 0x10b   : > { %v1852_v3 = vpop.eup %1851  ;;  %v710_v4 = vadd.f32 1.0, %v1850_v2 }
 0x10c   : > { %v708_v5 = vadd.f32 1.0, %v1852_v3 }
 0x10d   : > { %v1854_v9 = vpop.eup %1853  ;;  %1855 = vrcp.f32 %v710_v4 }
 0x10e   : > { %1857 = vrcp.f32 %v708_v5  ;;  %v709_v11 = vadd.f32 1.0, %v1854_v9 }
 0x110   : > { %1859 = vrcp.f32 %v709_v11 }
 0x111   : > { %1861 = vtanh.f32 %v695_v57 }
 0x112   : > { %1863 = vtanh.f32 %v693_v60 }
 0x113   : > { %1865 = vtanh.f32 %v694_v0  ;;  %v1844_v0 = vld [vmem:[%s2188_s7 + $0x8] sm:$0xff]  }
 0x117   : > { %v1856_v12 = vpop.eup %1855 }
 0x118   : > { %v1858_v13 = vpop.eup %1857  ;;  %724 = vrot.lane.b32.xlu1 %v1856_v12, %s1913_s15 }
 0x119   : > { %720 = vrot.lane.b32.xlu0 %v1858_v13, %s1913_s15 }
 0x11a   : > { %v1860_v15 = vpop.eup %1859 }
 0x11b   : > { %v1862_v20 = vpop.eup %1861 }
 0x11c   : > { %382 = vperm.xlu1 %1835, %v377_v14   ;;  %v1864_v21 = vpop.eup %1863 }
 0x11d   : > { %722 = vrot.lane.b32.xlu0 %v1860_v15, %s1913_s15  ;;  %v1866_v22 = vpop.eup %1865 }
 0x120   : > { %392 = vperm.xlu1 %1835, %v379_v16  }
 0x121   : > { %387 = vperm.xlu0 %1836, %v378_v17  }
 0x124   : > { %1039 = vrot.lane.b32.xlu1 %v2022_v54, %s1914_s16 }
 0x125   : > { %1041 = vrot.lane.b32.xlu0 %v2025_v59, %s1914_s16 }
 0x128   : > { %1043 = vrot.lane.b32.xlu1 %v2020_v51, %s1914_s16 }
 0x18a   : > { %v725_v19 = vpop.permute.xlu1 %724 }
 0x18b   : > { %v721_v18 = vpop.permute.xlu0 %720  ;;  %v731_v23 = vmul.f32 %v1862_v20, %v725_v19 }
 0x18c   : > { %v729_v25 = vmul.f32 %v1864_v21, %v721_v18 }
 0x18d   : > { %v733_v28 = vpack.c.bf16 %v731_v23, %v731_v23 }
 0x18f   : > { %v723_v24 = vpop.permute.xlu0 %722 }
 0x190   : > { %v730_v26 = vmul.f32 %v1866_v22, %v723_v24 }
 0x192   : > { %v732_v27 = vpack.c.bf16 %v730_v26, %v729_v25 }
 0x194   : > { %1768 = vmatprep.mubr.msk.bf16.mxu0 %vm470_vm1, %v732_v27 }
 0x195   : > { %1769 = vmatmul.mubr.msk.bf16.vlgmr.msra.gmra.mrb[8].mxu0 %vm470_vm1, %v733_v28 }
 0x196   : > { %1779 = vmatpush3.bf16.msra.mxu0 %v1842_v30 }
 0x197   : > { %1790 = vmatprep.subr.bf16.mxu0 %v1844_v0 }
 0x19b   : > { %v2053_v32 = vpop.permute.xlu1 %382 }
 0x19f   : > { %v2064_v41 = vpop.permute.xlu1 %392 }
 0x1a0   : > { %v2078_v47 = vpop.permute.xlu0 %387 }
 0x1a3   : > { %v1040_v16 = vpop.permute.xlu1 %1039 }
 0x1a4   : > { %v1042_v30 = vpop.permute.xlu0 %1041 }
 0x1a7   : > { %v1044_v23 = vpop.permute.xlu1 %1043 }
 0x268   : > { %v1770_v34 = vpop.f32.mrb[8].mxu0 }
 0x269   : > { %v2058_v35 = vadd.f32 %v1770_v34, %v1643_v33  ;;  %v789_v36 = vpop.f32.mrb[9].mxu0 }
 0x26a   : > { %v2060_v37 = vadd.f32 %v1643_v33, %v789_v36  ;;  %v1771_v38 = vpop.f32.mrb[10].mxu0 }
 0x26b   : > { %v805_v39 = vadd.f32 %v2058_v35, %v2000_v8  ;;  %v792_v40 = vpop.f32.mrb[11].mxu0 }
 0x26c   : > { %v803_v42 = vadd.f32 %v2060_v37, %v1996_v6  ;;  %v2068_v43 = vadd.f32 %v1643_v33, %v792_v40 }
 0x26d   : > { %v2071_v44 = vmul.f32 %v805_v39, %v2064_v41 }
 0x26e   : > { %v2074_v45 = vmul.f32 %v803_v42, %v2053_v32  ;;  %v804_v46 = vadd.f32 %v2068_v43, %v1998_v7 }
 0x26f   : > { %814 = vst.msk [vmem:[#allocation2 + $0x14] sm:$0xff] %vm470_vm1, %v2071_v44 }
 0x270   : > { %812 = vst.msk [vmem:[#allocation2 + $0x4] sm:$0xff] %vm470_vm1, %v2074_v45  ;;  %v2085_v6 = vmul.f32 %v804_v46, %v2078_v47 }
 0x272   : > { %813 = vst.msk [vmem:[#allocation2 + $0xc] sm:$0xff] %vm470_vm1, %v2085_v6 }
 0x276   : > { %v896_v49 = vld [vmem:[#allocation2 + $0x14] sm:$0xff] }
 0x277   : > { %v817_v8 = vld [vmem:[#allocation2 + $0x2] sm:$0xff]  ;;  %v898_v60 = vpack.c.bf16 %v896_v49, %v896_v49  ;;  %v967_v62 = vld [vmem:[#allocation2 + $0x16] sm:$0xff] }
 0x278   : > { %v894_v48 = vld [vmem:[#allocation2 + $0x4] sm:$0xff]  ;;  %v969_v63 = vpack.c.bf16 %v967_v62, %v967_v62 }
 0x279   : > { %v818_v50 = vld [vmem:[#allocation2 + $0xa] sm:$0xff]  ;;  %v819_v7 = vld [vmem:[#allocation2 + $0x12] sm:$0xff] }
 0x27a   : > { %v895_v52 = vld [vmem:[#allocation2 + $0xc] sm:$0xff]  ;;  %v820_v53 = vpack.c.bf16 %v818_v50, %v817_v8  ;;  %v821_v56 = vpack.c.bf16 %v819_v7, %v819_v7 }
 0x27b   : > { %v897_v55 = vpack.c.bf16 %v895_v52, %v894_v48  ;;  %v965_v57 = vld [vmem:[#allocation2 + $0x6] sm:$0xff]  ;;  %v966_v58 = vld [vmem:[#allocation2 + $0xe] sm:$0xff] }
 0x27c   : > { %1774 = vmatprep.mubr.msk.bf16.mxu1 %vm470_vm1, %v820_v53  ;;  %v968_v61 = vpack.c.bf16 %v966_v58, %v965_v57 }
 0x27d   : > { %1780 = vmatprep.mubr.msk.bf16.mxu0 %vm470_vm1, %v897_v55  ;;  %1775 = vmatmul.mubr.msk.bf16.vlgmr.msra.gmra.mrb[8].mxu1 %vm470_vm1, %v821_v56 }
 0x27e   : > { %1781 = vmatmul.mubr.msk.bf16.vlgmr.msra.gmra.mrb[12].mxu0 %vm470_vm1, %v898_v60  ;;  %1785 = vmatpush3.bf16.msra.mxu1 %v1843_v31 }
 0x27f   : > { %1786 = vmatprep.mubr.msk.bf16.mxu1 %vm470_vm1, %v968_v61  ;;  %1791 = vmatpush3.bf16.msra.mxu0 %v1844_v0  ;;  %v1670_v0 = vld [vmem:[%s2189_s8 + $0x1] ss:$0 sm:$0xff] }
 0x285   : > { %1787 = vmatmul.mubr.msk.bf16.vlgmr.msra.gmra.mrb[12].mxu1 %vm470_vm1, %v969_v63 }
 0x350   : > { %v1776_v2 = vpop.f32.mrb[8].mxu1 }
 0x351   : > { %v1782_v3 = vpop.f32.mrb[12].mxu0  ;;  %v893_v4 = vadd.f32 %v1776_v2, %v1653_v1  ;;  %v871_v5 = vpop.f32.mrb[9].mxu1 }
 0x352   : > { %v948_v9 = vpop.f32.mrb[13].mxu0  ;;  %v891_v10 = vadd.f32 %v1653_v1, %v871_v5  ;;  %v1777_v11 = vpop.f32.mrb[10].mxu1 }
 0x353   : > { %v1783_v12 = vpop.f32.mrb[14].mxu0  ;;  %v964_v13 = vadd.f32 %v1782_v3, %v893_v4  ;;  %v874_v14 = vpop.f32.mrb[11].mxu1 }
 0x354   : > { %v951_v15 = vpop.f32.mrb[15].mxu0  ;;  %v962_v17 = vadd.f32 %v948_v9, %v891_v10  ;;  %v892_v18 = vadd.f32 %v1653_v1, %v874_v14 }
 0x356   : > { %v963_v19 = vadd.f32 %v951_v15, %v892_v18 }
 0x358   : > { %v1788_v20 = vpop.f32.mrb[12].mxu1 }
 0x359   : > { %v1035_v21 = vadd.f32 %v1788_v20, %v964_v13  ;;  %v1019_v22 = vpop.f32.mrb[13].mxu1 }
 0x35a   : > { %v1033_v24 = vadd.f32 %v1019_v22, %v962_v17  ;;  %v1789_v25 = vpop.f32.mrb[14].mxu1 }
 0x35b   : > { %v1050_v26 = vadd.f32 %v1044_v23, %v1035_v21  ;;  %v1022_v27 = vpop.f32.mrb[15].mxu1 }
 0x35c   : > { %v1048_v28 = vadd.f32 %v1040_v16, %v1033_v24  ;;  %v1034_v29 = vadd.f32 %v1022_v27, %v963_v19  ;;  %v1848_v27 = vld [vmem:[%s2188_s7 + $0x10] sm:$0xff]  }
 0x35d   : > { %v1666_v31 = vmul.f32 -1.442695, %v1050_v26 }
 0x35e   : > { %v1664_v33 = vmul.f32 -1.442695, %v1048_v28  ;;  %v1049_v34 = vadd.f32 %v1042_v30, %v1034_v29 }
 0x35f   : > { %1867 = vpow2.f32 %v1666_v31 }
 0x360   : > { %1869 = vpow2.f32 %v1664_v33  ;;  %v1665_v36 = vmul.f32 -1.442695, %v1049_v34 }
 0x362   : > { %1871 = vpow2.f32 %v1665_v36 }
 0x369   : > { %v1868_v38 = vpop.eup %1867 }
 0x36a   : > { %v1870_v39 = vpop.eup %1869  ;;  %v1065_v46 = vadd.f32 1.0, %v1868_v38 }
 0x36b   : > { %v1063_v40 = vadd.f32 1.0, %v1870_v39 }
 0x36c   : > { %v1872_v42 = vpop.eup %1871 }
 0x36d   : > { %1873 = vrcp.f32 %v1063_v40  ;;  %v1064_v8 = vadd.f32 1.0, %v1872_v42 }
 0x36f   : > { %1875 = vrcp.f32 %v1064_v8 }
 0x370   : > { %1877 = vrcp.f32 %v1065_v46 }
 0x371   : > { %1879 = vtanh.f32 %v1048_v28  ;;  %v1680_v28 = vld [vmem:[%s2185_s4 + $0x2] ss:$0 sm:$0xff] }
 0x372   : > { %1881 = vtanh.f32 %v1049_v34 }
 0x373   : > { %1883 = vtanh.f32 %v1050_v26 }
 0x377   : > { %v1874_v48 = vpop.eup %1873 }
 0x378   : > { %1075 = vrot.lane.b32.xlu0 %v1874_v48, %s1913_s15 }
 0x379   : > { %v1876_v49 = vpop.eup %1875 }
 0x37a   : > { %1077 = vrot.lane.b32.xlu1 %v1876_v49, %s1913_s15  ;;  %v1878_v50 = vpop.eup %1877 }
 0x37b   : > { %v1880_v7 = vpop.eup %1879 }
 0x37c   : > { %1079 = vrot.lane.b32.xlu0 %v1878_v50, %s1913_s15  ;;  %v1882_v53 = vpop.eup %1881 }
 0x37d   : > { %v1884_v58 = vpop.eup %1883 }
 0x37e   : > { %1393 = vrot.lane.b32.xlu1 %v2022_v54, %s1915_s10  ;;  %v1846_v54 = vld [vmem:[%s2184_s3 + $0x38] sm:$0xff]  }
 0x37f   : > { %1802 = vmatprep.subr.bf16.mxu0 %v1846_v54 }
 0x380   : > { %1395 = vrot.lane.b32.xlu0 %v2025_v59, %s1915_s10  ;;  %v1847_v59 = vld [vmem:[%s2184_s3 + $0x40] sm:$0xff]  }
 0x382   : > { %1397 = vrot.lane.b32.xlu1 %v2020_v51, %s1915_s10  ;;  %v1845_v51 = vld [vmem:[%s2184_s3 + $0x30] sm:$0xff]  }
 0x383   : > { %1796 = vmatprep.subr.bf16.mxu1 %v1845_v51 }
 0x384   : > { %1797 = vmatpush3.bf16.msra.mxu1 %v1845_v51 }
 0x385   : > { %1808 = vmatprep.subr.bf16.mxu1 %v1847_v59 }
 0x3ea   : > { %v1076_v52 = vpop.permute.xlu0 %1075 }
 0x3eb   : > { %v1084_v56 = vmul.f32 %v1880_v7, %v1076_v52 }
 0x3ec   : > { %v1078_v55 = vpop.permute.xlu1 %1077 }
 0x3ed   : > { %v1085_v57 = vmul.f32 %v1882_v53, %v1078_v55 }
 0x3ee   : > { %v1080_v60 = vpop.permute.xlu0 %1079 }
 0x3ef   : > { %v1087_v61 = vpack.c.bf16 %v1085_v57, %v1084_v56  ;;  %v1086_v62 = vmul.f32 %v1884_v58, %v1080_v60 }
 0x3f0   : > { %v1394_v8 = vpop.permute.xlu1 %1393 }
 0x3f1   : > { %v1088_v63 = vpack.c.bf16 %v1086_v62, %v1086_v62  ;;  %1792 = vmatprep.mubr.msk.bf16.mxu0 %vm470_vm1, %v1087_v61 }
 0x3f3   : > { %1793 = vmatmul.mubr.msk.bf16.vlgmr.msra.gmra.mrb[16].mxu0 %vm470_vm1, %v1088_v63  ;;  %v1396_v63 = vpop.permute.xlu0 %1395 }
 0x3f4   : > { %1803 = vmatpush3.bf16.msra.mxu0 %v1846_v54  ;;  %v1398_v55 = vpop.permute.xlu1 %1397 }
 0x3f5   : > { %1814 = vmatprep.subr.bf16.mxu0 %v1848_v27 }
 0x4c6   : > { %v1794_v1 = vpop.f32.mrb[16].mxu0 }
 0x4c7   : > { %v2121_v2 = vadd.f32 %v1794_v1, %v1670_v0  ;;  %v1146_v3 = vpop.f32.mrb[17].mxu0 }
 0x4c8   : > { %v2123_v4 = vadd.f32 %v1670_v0, %v1146_v3  ;;  %v1795_v5 = vpop.f32.mrb[18].mxu0 }
 0x4c9   : > { %v1162_v9 = vadd.f32 %v2121_v2, %v2071_v44  ;;  %v1149_v10 = vpop.f32.mrb[19].mxu0 }
 0x4ca   : > { %v1160_v11 = vadd.f32 %v2123_v4, %v2074_v45  ;;  %v2129_v12 = vadd.f32 %v1670_v0, %v1149_v10 }
 0x4cb   : > { %v1165_v13 = vmul.f32 %v1162_v9, %v2064_v41 }
 0x4cc   : > { %v1163_v14 = vmul.f32 %v1160_v11, %v2053_v32  ;;  %v1161_v15 = vadd.f32 %v2129_v12, %v2085_v6 }
 0x4cd   : > { %1171 = vst.msk [vmem:[#allocation2 + $0x14] sm:$0xff] %vm470_vm1, %v1165_v13 }
 0x4ce   : > { %1169 = vst.msk [vmem:[#allocation2 + $0x4] sm:$0xff] %vm470_vm1, %v1163_v14  ;;  %v1164_v16 = vmul.f32 %v1161_v15, %v2078_v47 }
 0x4d0   : > { %1170 = vst.msk [vmem:[#allocation2 + $0xc] sm:$0xff] %vm470_vm1, %v1164_v16 }
 0x4d4   : > { %v1253_v45 = vld [vmem:[#allocation2 + $0x14] sm:$0xff] }
 0x4d5   : > { %v1174_v44 = vld [vmem:[#allocation2] sm:$0xff]  ;;  %v1255_v24 = vpack.c.bf16 %v1253_v45, %v1253_v45  ;;  %v1324_v25 = vld [vmem:[#allocation2 + $0x18] sm:$0xff] }
 0x4d6   : > { %v1251_v17 = vld [vmem:[#allocation2 + $0x4] sm:$0xff]  ;;  %v1326_v26 = vpack.c.bf16 %v1324_v25, %v1324_v25 }
 0x4d7   : > { %v1175_v18 = vld [vmem:[#allocation2 + $0x8] sm:$0xff]  ;;  %v1176_v20 = vld [vmem:[#allocation2 + $0x10] sm:$0xff] }
 0x4d8   : > { %v1252_v19 = vld [vmem:[#allocation2 + $0xc] sm:$0xff]  ;;  %v1177_v21 = vpack.c.bf16 %v1175_v18, %v1174_v44  ;;  %v1178_v23 = vpack.c.bf16 %v1176_v20, %v1176_v20  ;;  %v1325_v6 = vpack.c.bf16 %v1176_v20, %v1175_v18 }
 0x4d9   : > { %v1254_v22 = vpack.c.bf16 %v1252_v19, %v1251_v17 }
 0x4da   : > { %1798 = vmatprep.mubr.msk.bf16.mxu1 %vm470_vm1, %v1177_v21 }
 0x4db   : > { %1804 = vmatprep.mubr.msk.bf16.mxu0 %vm470_vm1, %v1254_v22  ;;  %1799 = vmatmul.mubr.msk.bf16.vlgmr.msra.gmra.mrb[16].mxu1 %vm470_vm1, %v1178_v23 }
 0x4dc   : > { %1805 = vmatmul.mubr.msk.bf16.vlgmr.msra.gmra.mrb[20].mxu0 %vm470_vm1, %v1255_v24  ;;  %1809 = vmatpush3.bf16.msra.mxu1 %v1847_v59 }
 0x4dd   : > { %1810 = vmatprep.mubr.msk.bf16.mxu1 %vm470_vm1, %v1325_v6  ;;  %1815 = vmatpush3.bf16.msra.mxu0 %v1848_v27  ;;  %v1697_v6 = vld [vmem:[%s2189_s8 + $0x2] ss:$0 sm:$0xff] }
 0x4e3   : > { %1811 = vmatmul.mubr.msk.bf16.vlgmr.msra.gmra.mrb[20].mxu1 %vm470_vm1, %v1326_v26  ;;  %v1168_v26 = vadd.f32 %v2121_v2, %v2058_v35 }
 0x5ae   : > { %v1800_v29 = vpop.f32.mrb[16].mxu1 }
 0x5af   : > { %v1806_v30 = vpop.f32.mrb[20].mxu0  ;;  %v1250_v31 = vadd.f32 %v1800_v29, %v1680_v28  ;;  %v1228_v33 = vpop.f32.mrb[17].mxu1  ;;  %v1166_v29 = vadd.f32 %v2123_v4, %v2060_v37 }
 0x5b0   : > { %v1305_v34 = vpop.f32.mrb[21].mxu0  ;;  %v1248_v36 = vadd.f32 %v1680_v28, %v1228_v33  ;;  %v1801_v38 = vpop.f32.mrb[18].mxu1 }
 0x5b1   : > { %v1807_v39 = vpop.f32.mrb[22].mxu0  ;;  %v1321_v40 = vadd.f32 %v1806_v30, %v1250_v31  ;;  %v1231_v42 = vpop.f32.mrb[19].mxu1 }
 0x5b2   : > { %v1308_v46 = vpop.f32.mrb[23].mxu0  ;;  %v1319_v48 = vadd.f32 %v1305_v34, %v1248_v36  ;;  %v1249_v49 = vadd.f32 %v1680_v28, %v1231_v42  ;;  %v1167_v36 = vadd.f32 %v2129_v12, %v2068_v43 }
 0x5b4   : > { %v1320_v50 = vadd.f32 %v1308_v46, %v1249_v49 }
 0x5b6   : > { %v1812_v52 = vpop.f32.mrb[20].mxu1 }
 0x5b7   : > { %v1392_v7 = vadd.f32 %v1812_v52, %v1321_v40  ;;  %v1376_v53 = vpop.f32.mrb[21].mxu1 }
 0x5b8   : > { %v1390_v56 = vadd.f32 %v1376_v53, %v1319_v48  ;;  %v1813_v57 = vpop.f32.mrb[22].mxu1 }
 0x5b9   : > { %v1404_v58 = vadd.f32 %v1398_v55, %v1392_v7  ;;  %v1379_v60 = vpop.f32.mrb[23].mxu1 }
 0x5ba   : > { %v1402_v61 = vadd.f32 %v1394_v8, %v1390_v56  ;;  %v1391_v62 = vadd.f32 %v1379_v60, %v1320_v50 }
 0x5bb   : > { %v1693_v51 = vmul.f32 -1.442695, %v1404_v58 }
 0x5bc   : > { %v1691_v54 = vmul.f32 -1.442695, %v1402_v61  ;;  %v1403_v59 = vadd.f32 %v1396_v63, %v1391_v62 }
 0x5bd   : > { %1885 = vpow2.f32 %v1693_v51 }
 0x5be   : > { %1887 = vpow2.f32 %v1691_v54  ;;  %v1692_v0 = vmul.f32 -1.442695, %v1403_v59 }
 0x5c0   : > { %1889 = vpow2.f32 %v1692_v0 }
 0x5c7   : > { %v1886_v1 = vpop.eup %1885 }
 0x5c8   : > { %v1888_v3 = vpop.eup %1887  ;;  %v1419_v10 = vadd.f32 1.0, %v1886_v1 }
 0x5c9   : > { %v1417_v5 = vadd.f32 1.0, %v1888_v3 }
 0x5ca   : > { %v1890_v9 = vpop.eup %1889 }
 0x5cb   : > { %1891 = vrcp.f32 %v1417_v5  ;;  %v1418_v11 = vadd.f32 1.0, %v1890_v9 }
 0x5cd   : > { %1893 = vrcp.f32 %v1418_v11 }
 0x5ce   : > { %1895 = vrcp.f32 %v1419_v10 }
 0x5cf   : > { %1897 = vtanh.f32 %v1402_v61 }
 0x5d0   : > { %1899 = vtanh.f32 %v1403_v59 }
 0x5d1   : > { %1901 = vtanh.f32 %v1404_v58 }
 0x5d5   : > { %v1892_v13 = vpop.eup %1891 }
 0x5d6   : > { %1429 = vrot.lane.b32.xlu0 %v1892_v13, %s1913_s15 }
 0x5d7   : > { %v1894_v14 = vpop.eup %1893 }
 0x5d8   : > { %1431 = vrot.lane.b32.xlu1 %v1894_v14, %s1913_s15  ;;  %v1896_v15 = vpop.eup %1895 }
 0x5d9   : > { %v1898_v44 = vpop.eup %1897 }
 0x5da   : > { %1433 = vrot.lane.b32.xlu0 %v1896_v15, %s1913_s15  ;;  %v1900_v17 = vpop.eup %1899 }
 0x5db   : > { %v1902_v20 = vpop.eup %1901 }
 0x648   : > { %v1430_v16 = vpop.permute.xlu0 %1429 }
 0x649   : > { %v1438_v18 = vmul.f32 %v1898_v44, %v1430_v16 }
 0x64a   : > { %v1432_v45 = vpop.permute.xlu1 %1431 }
 0x64b   : > { %v1439_v19 = vmul.f32 %v1900_v17, %v1432_v45 }
 0x64c   : > { %v1434_v21 = vpop.permute.xlu0 %1433 }
 0x64d   : > { %v1441_v22 = vpack.c.bf16 %v1439_v19, %v1438_v18  ;;  %v1440_v23 = vmul.f32 %v1902_v20, %v1434_v21 }
 0x64f   : > { %v1442_v24 = vpack.c.bf16 %v1440_v23, %v1440_v23  ;;  %1816 = vmatprep.mubr.msk.bf16.mxu0 %vm470_vm1, %v1441_v22 }
 0x651   : > { %1817 = vmatmul.mubr.msk.bf16.vlgmr.msra.gmra.mrb[24].mxu0 %vm470_vm1, %v1442_v24 }
 0x724   : > { %v1818_v25 = vpop.f32.mrb[24].mxu0 }
 0x725   : > { %v1509_v27 = vadd.f32 %v1818_v25, %v1697_v6  ;;  %v1500_v28 = vpop.f32.mrb[25].mxu0 }
 0x726   : > { %v1501_v30 = vadd.f32 %v1697_v6, %v1500_v28  ;;  %v1819_v31 = vpop.f32.mrb[26].mxu0 }
 0x727   : > { %v1516_v33 = vadd.f32 %v1509_v27, %v1168_v26  ;;  %v1503_v34 = vpop.f32.mrb[27].mxu0 }
 0x728   : > { %v1514_v38 = vadd.f32 %v1501_v30, %v1166_v29  ;;  %v1504_v39 = vadd.f32 %v1697_v6, %v1503_v34 }
 0x729   : > { %v1519_v37 = vmul.f32 %v1516_v33, %v2064_v41 }
 0x72a   : > { %v1515_v40 = vadd.f32 %v1504_v39, %v1167_v36  ;;  %v1517_v42 = vmul.f32 %v1514_v38, %v2053_v32 }
 0x72c   : > { %1523 = vrot.lane.b32.xlu1 %v1517_v42, %s1913_s15  ;;  %v1518_v35 = vmul.f32 %v1515_v40, %v2078_v47 }
 0x72e   : > { %1525 = vrot.lane.b32.xlu0 %v1518_v35, %s1913_s15 }
 0x730   : > { %1527 = vrot.lane.b32.xlu1 %v1519_v37, %s1913_s15 }
 0x79e   : > { %v1524_v43 = vpop.permute.xlu1 %1523 }
 0x79f   : > { %1532 = vst.msk [vmem:[%s372_s29] sm:$0xff] %vm470_vm1, %v1524_v43 }
 0x7a0   : > { %v1526_v2 = vpop.permute.xlu0 %1525 }
 0x7a1   : > { %1533 = vst.msk [vmem:[%s372_s29 + $0x8] sm:$0xff] %vm470_vm1, %v1526_v2 }
 0x7a2   : > { %v1528_v32 = vpop.permute.xlu1 %1527 }
 0x7a3   : > { %1534 = vst.msk [vmem:[%s372_s29 + $0x10] sm:$0xff] %vm470_vm1, %v1528_v32 }
 0x7a4 PF: > { %s19_s30 = sadd.s32 1, %s1909_s30  }
 0x7a5   : > { %p16_p4 = scmp.ge.s32.totalorder %s19_s30, 4  }
 0x7a7   :  { %18 = sbr.rel (!%p16_p4) target bundleno = 1 (0x1), region = 106 }

</bundles_post_ra>
